<compile_context>
chip_gen: v7x
topology: tpu7x:2x2x1
jax: 0.10.0
libtpu: 0.0.40
codegen_flags: <defaults>
</compile_context>

<pallas_src>
import jax
import jax.numpy as jnp
from jax.experimental import pallas as pl
from jax.experimental.pallas import tpu as pltpu


def _round_up(n, m):
    return ((n + m - 1) // m) * m


def _sublane_align(dtype):
    # Packed sublane tile height: 8 rows for 32-bit, 16 for bf16, 32 for int8.
    return 8 * max(1, 4 // jnp.dtype(dtype).itemsize)


def _vmem_capacity_bytes():
    try:
        return int(pltpu.get_tpu_info().vmem_capacity_bytes)
    except Exception:
        return 64 * 1024 * 1024  # conservative fallback = v7x per-core VMEM


def _lora_kernel(x_ref, a_ref, b_ref, o_ref):
    # First matmul (K = in_dim, the only non-trivial FLOP term) on the MXU.
    # x is cast to bf16 in-kernel (one VPU pass, hidden under the tile DMA);
    # accumulation stays f32 via preferred_element_type.
    x = x_ref[...].astype(a_ref.dtype)
    xa = jnp.dot(x, a_ref[...], preferred_element_type=jnp.float32)
    # Second matmul (K = rank) also on the MXU; alpha is already folded into
    # b_ref (f32), so the (bm, rank) intermediate takes no extra rounding.
    y = jnp.dot(xa, b_ref[...], preferred_element_type=jnp.float32)
    o_ref[...] = y.astype(o_ref.dtype)


def lora_forward(x, A, B, alpha, *, block_m=1024, compute_dtype=jnp.bfloat16,
                 out_dtype=None):
    """y = alpha * (x @ A @ B), tiled over the batch/token dimension.

    A (bf16) and alpha*B (f32) stay VMEM-resident across all grid steps; the
    x tiles (native dtype) and y tiles are double-buffered by the BlockSpec
    pipeline.
    """
    orig_shape = x.shape
    in_dim = orig_shape[-1]
    in_dim_a, rank = A.shape
    rank_b, out_dim = B.shape
    assert in_dim == in_dim_a and rank == rank_b

    x2 = x.reshape(-1, in_dim)
    batch = x2.shape[0]
    out_dtype = x.dtype if out_dtype is None else jnp.dtype(out_dtype)

    # Tiny parameter transforms only (rank-sized): cast A, fold alpha into B.
    A_k = A.astype(compute_dtype)
    B_k = jnp.asarray(alpha, jnp.float32) * B.astype(jnp.float32)

    # Lane-dense output stores: pad B's out axis only when out_dim is not a
    # multiple of 128 (only then is a final slice over y needed).
    if out_dim % 128 == 0:
        out_dim_k = out_dim
    else:
        out_dim_k = _round_up(out_dim, 128)
        B_k = jnp.pad(B_k, ((0, 0), (0, out_dim_k - out_dim)))

    x_bytes = jnp.dtype(x2.dtype).itemsize
    o_bytes = jnp.dtype(out_dtype).itemsize

    # ---- Generation-aware row tile (per-TensorCore VMEM budget) ----------
    vmem_cap = _vmem_capacity_bytes()
    vmem_limit = min(int(vmem_cap * 3 // 4), 112 * 1024 * 1024)
    stream_budget = int(vmem_limit * 0.8)
    resident = 2 * (in_dim * rank * jnp.dtype(compute_dtype).itemsize
                    + rank * out_dim_k * 4)                 # A + alpha*B
    per_row = 2 * (in_dim * x_bytes + out_dim_k * o_bytes)  # x + y, dbl-buffered
    row_align = max(_sublane_align(x2.dtype), _sublane_align(out_dtype))

    bm = max(row_align, (stream_budget - resident) // per_row)
    bm = min(bm, block_m, _round_up(batch, row_align))
    if batch > row_align:
        # Keep >= 2 grid steps so the "parallel" axis can shard across v7x's
        # two TensorCores (harmless on single-TC v5e/v6e).
        bm = min(bm, _round_up(pl.cdiv(batch, 2), row_align))
    bm = max(row_align, (bm // row_align) * row_align)

    grid = (pl.cdiv(batch, bm),)

    cost = pl.CostEstimate(
        flops=2 * batch * rank * (in_dim + out_dim),
        transcendentals=0,
        bytes_accessed=(batch * in_dim * x_bytes
                        + batch * out_dim * o_bytes
                        + int(A_k.size) * A_k.dtype.itemsize
                        + int(B_k.size) * B_k.dtype.itemsize),
    )

    y = pl.pallas_call(
        _lora_kernel,
        out_shape=jax.ShapeDtypeStruct((batch, out_dim_k), out_dtype),
        grid=grid,
        in_specs=[
            pl.BlockSpec((bm, in_dim), lambda i: (i, 0)),       # x (streamed)
            pl.BlockSpec((in_dim, rank), lambda i: (0, 0)),     # A (resident)
            pl.BlockSpec((rank, out_dim_k), lambda i: (0, 0)),  # alpha*B (resident)
        ],
        out_specs=pl.BlockSpec((bm, out_dim_k), lambda i: (i, 0)),
        compiler_params=pltpu.CompilerParams(
            dimension_semantics=("parallel",),
            vmem_limit_bytes=vmem_limit,
        ),
        cost_estimate=cost,
    )(x2, A_k, B_k)

    if out_dim_k != out_dim:
        y = y[:, :out_dim]
    return y.reshape(*orig_shape[:-1], out_dim)


def _lora_reference(x, A, B, alpha, compute_dtype=jnp.bfloat16):
    # Plain-JAX reference with the same numerics as the kernel:
    # x, A rounded to bf16, f32 accumulation, alpha folded into f32 B.
    xc = x.astype(compute_dtype).astype(jnp.float32)
    Ac = A.astype(compute_dtype).astype(jnp.float32)
    Bc = jnp.asarray(alpha, jnp.float32) * B.astype(jnp.float32)
    return ((xc @ Ac) @ Bc).astype(x.dtype)


if __name__ == "__main__":
    # Deterministic parameters mirroring LoRALayer.__init__:
    #   A ~ randn(in_dim, rank) / sqrt(rank),  B = zeros(rank, out_dim)
    in_dim, out_dim, rank, alpha = 32, 32, 4, 2.0
    batch = 40  # not a multiple of the chosen row tile -> ragged last block

    key = jax.random.PRNGKey(0)
    k_x, k_a, k_b = jax.random.split(key, 3)

    std_dev = 1.0 / jnp.sqrt(jnp.float32(rank))
    A = jax.random.normal(k_a, (in_dim, rank), dtype=jnp.float32) * std_dev
    B0 = jnp.zeros((rank, out_dim), dtype=jnp.float32)
    x = jax.random.normal(k_x, (batch, in_dim), dtype=jnp.float32)

    # Freshly-initialized LoRA layer: B == 0 -> output must be exactly zero.
    y0 = lora_forward(x, A, B0, alpha)
    jax.block_until_ready(y0)
    assert y0.shape == (batch, out_dim)
    assert jnp.allclose(y0, jnp.zeros_like(y0))

    # Non-trivial B (as after training) to validate the math end-to-end.
    B1 = jax.random.normal(k_b, (rank, out_dim), dtype=jnp.float32) * 0.1
    y1 = lora_forward(x, A, B1, alpha)
    jax.block_until_ready(y1)
    y1_ref = _lora_reference(x, A, B1, alpha)
    assert jnp.allclose(y1, y1_ref, atol=2e-2, rtol=2e-2)

    print("KERNEL_OK")
</pallas_src>

<mosaic_0001>
module attributes {stable_mosaic.version = 11 : i64} {
  func.func @_lora_kernel(%arg0: i32, %arg1: memref<24x32xf32, #tpu.memory_space<vmem>>, %arg2: memref<32x4xbf16, #tpu.memory_space<vmem>>, %arg3: memref<4x128xf32, #tpu.memory_space<vmem>>, %arg4: memref<24x128xf32, #tpu.memory_space<vmem>>) attributes {dimension_semantics = [#tpu.dimension_semantics<parallel>], iteration_bounds = array<i64: 2>, scalar_prefetch = 0 : i64, scratch_operands = 0 : i64, tpu.core_type = #tpu.core_type<tc>, window_params = [{transform_indices = @transform_0, window_bounds = array<i64: 24, 32>}, {pipeline_mode = #tpu.pipeline_mode<synchronous>, transform_indices = @transform_1, window_bounds = array<i64: 32, 4>}, {pipeline_mode = #tpu.pipeline_mode<synchronous>, transform_indices = @transform_2, window_bounds = array<i64: 4, 128>}, {transform_indices = @transform_3, window_bounds = array<i64: 24, 128>}]} {
    %c0 = arith.constant 0 : index
    %c0_0 = arith.constant 0 : index
    %0 = vector.load %arg1[%c0, %c0_0] : memref<24x32xf32, #tpu.memory_space<vmem>>, vector<24x32xf32>
    %1 = arith.truncf %0 : vector<24x32xf32> to vector<24x32xbf16>
    %c0_1 = arith.constant 0 : index
    %c0_2 = arith.constant 0 : index
    %2 = vector.load %arg2[%c0_1, %c0_2] : memref<32x4xbf16, #tpu.memory_space<vmem>>, vector<32x4xbf16>
    %cst = arith.constant dense<0.000000e+00> : vector<24x4xf32>
    %3 = tpu.matmul %1, %2, %cst {dimension_numbers = #tpu.dot_dimension_numbers<[1], [0], [0], [1], [0, 0, 1, 1], [], []>} : vector<24x32xbf16>, vector<32x4xbf16>, vector<24x4xf32> -> vector<24x4xf32>
    %c0_3 = arith.constant 0 : index
    %c0_4 = arith.constant 0 : index
    %4 = vector.load %arg3[%c0_3, %c0_4] : memref<4x128xf32, #tpu.memory_space<vmem>>, vector<4x128xf32>
    %cst_5 = arith.constant dense<0.000000e+00> : vector<24x128xf32>
    %5 = tpu.matmul %3, %4, %cst_5 {dimension_numbers = #tpu.dot_dimension_numbers<[1], [0], [0], [1], [0, 0, 1, 1], [], []>} : vector<24x4xf32>, vector<4x128xf32>, vector<24x128xf32> -> vector<24x128xf32>
    %c0_6 = arith.constant 0 : index
    %c0_7 = arith.constant 0 : index
    %6 = vector.load %arg4[%c0_6, %c0_7] : memref<24x128xf32, #tpu.memory_space<vmem>>, vector<24x128xf32>
    tpu.vector_store %arg4[%c0_6, %c0_7], %5 {strides = array<i32>} : memref<24x128xf32, #tpu.memory_space<vmem>>, vector<24x128xf32>,
    return
  }
  func.func @transform_0(%arg0: i32) -> (i32, i32) {
    %c0_i32 = arith.constant 0 : i32
    %c0_i32_0 = arith.constant 0 : i32
    return %arg0, %c0_i32 : i32, i32
  }
  func.func @transform_1(%arg0: i32) -> (i32, i32) {
    %c0_i32 = arith.constant 0 : i32
    %c0_i32_0 = arith.constant 0 : i32
    %c0_i32_1 = arith.constant 0 : i32
    return %c0_i32, %c0_i32_0 : i32, i32
  }
  func.func @transform_2(%arg0: i32) -> (i32, i32) {
    %c0_i32 = arith.constant 0 : i32
    %c0_i32_0 = arith.constant 0 : i32
    %c0_i32_1 = arith.constant 0 : i32
    return %c0_i32, %c0_i32_0 : i32, i32
  }
  func.func @transform_3(%arg0: i32) -> (i32, i32) {
    %c0_i32 = arith.constant 0 : i32
    %c0_i32_0 = arith.constant 0 : i32
    return %arg0, %c0_i32 : i32, i32
  }
}

</mosaic_0001>

<bundles_post_ra>
// kernel: tpu_custom_call.1
= control target key start
LH: loop header
LB: loop body
LE: loop exit
PB: predicated region body
PF: predicated region fallthrough
CT: control target
= control target key end

     0   :  { %8 = vsyncpa [#allocation3], 0  ;;  %s761_s0 = inlined_call_operand.vmem [shape: f32[40,32], index: 0, kind: input, shape index: {}]   ;;  %s762_s1 = inlined_call_operand.vmem [shape: bf16[32,4], index: 1, kind: input, shape index: {}]   ;;  %s763_s2 = inlined_call_operand.vmem [shape: f32[4,128], index: 2, kind: input, shape index: {}]   ;;  %s764_s3 = inlined_call_operand.hbm [shape: f32[40,128], index: 3, kind: output, shape index: {}]  }
   0x1   :  { %10 = vsyncpa [#allocation3 + $0x1], 0  ;;  %s635_s12 = smov 0   ;;  %s637_s13 = smov 0  }
   0x2   :  { %s639_s14 = smov 0   ;;  %s641_s15 = smov 0  }
   0x3 LB: > { %s656_s16 = sadd.s32 4294967295, %s608_s15   ;;  %s453_s17 = sadd.s32 4294967294, %s608_s15   ;;  %s608_s15 = sphi %s641_s15, %s770_s15   ;;  %s604_s14 = sphi %s639_s14, %s769_s14   ;;  %s600_s13 = sphi %s637_s13, %s768_s13   ;;  %s596_s12 = sphi %s635_s12, %s767_s12  }
   0x4   : > { %s660_s18 = sadd.s32 1, %s608_s15   ;;  %s91_s19 = sadd.s32 1, %s604_s14 }
   0x5   : > { %s88_s20 = ssub.s32 %s608_s15, %s660_s18  ;;  %p101_p0 = scmp.ne.s32.totalorder %s604_s14, %s600_s13 }
   0x6   : > { %p89_p1 = scmp.eq.s32.totalorder %s88_s20, 0  ;;  %p102_p2 = scmp.eq.s32.totalorder %s656_s16, 1 }
   0x7   : > { %p107_p3 = scmp.ne.s32.totalorder %s600_s13, %s596_s12  ;;  %p108_p4 = scmp.eq.s32.totalorder %s453_s17, 1 }
   0x8   : > { %s671_s21 = scalar_select %p89_p1, %s604_s14, %s91_s19  }
   0x9   : > { %p673_p5 = por %p102_p2, %p101_p0  ;;  %p677_p6 = por %p108_p4, %p107_p3 }
   0xa   : > { %p456_p7 = scmp.ge.s32.totalorder %s608_s15, 1  ;;  %p149_p8 = scmp.lt.s32.totalorder %s608_s15, 3 }
   0xc   : > { %p150_p9 = pnand %p456_p7, %p149_p8 }
   0xd   : > { %v544_v0 = vld [vmem:[%s762_s1] sm:$0xff] (!%p150_p9)   ;;  %s687_s26 = smul.u32 (!%p150_p9), 3, %s656_s16  ;;  %v545_v1 = vld [vmem:[%s762_s1 + $0x8] sm:$0xff] (!%p150_p9)   ;;  %vm218_vm0 = vcmask (!%p150_p9), 261120   ;;  %v610_v7 = vmov (!%p150_p9), 0.0   ;;  %vm284_vm1 = vcmask (!%p150_p9), 1043456  }
   0xe   : > { %153 = sbr.rel (%p150_p9) target bundleno = 491 (0x1eb), region = 32  ;;  %482 = vmatprep.subr.bf16.mxu0 (!%p150_p9), %v544_v0  ;;  %490 = vmatprep.subr.mxu1 (!%p150_p9), %v610_v7  ;;  %v273_v8 = vld [vmem:[%s763_s2] sm:$0xf] (!%p150_p9)  ;;  %vm611_vm2 = vmmov (!%p150_p9), 0   ;;  %vm274_vm3 = vcmask (!%p150_p9), 31744   ;;  %s174_s9 = sand.u32 (!%p150_p9), 1, %s600_s13  }
   0xf   : > { %p182_p10 = scmp.lt.s32.totalorder (!%p150_p9), %s687_s26, 4  ;;  %483 = vmatpush3.bf16.msra.mxu0 (!%p150_p9), %v544_v0  ;;  %491 = vmatpush3.msk.msra.mxu1 (!%p150_p9), %vm284_vm1, %v273_v8  ;;  %s501_s10 = smul.u32 (!%p150_p9), 24, %s174_s9 }
  0x10   : > { %484 = vmatprep.subr.bf16.mxu0 (!%p150_p9), %v545_v1  ;;  %492 = vmatprep.mubr.msk.f32.mxu1 (!%p150_p9), %vm611_vm2, %v610_v7  ;;  %s701_s17 = scalar_lea.sflag (!%p150_p9), [#allocation3], %s174_s9 }
  0x11   : > { %s176_s11 = scalar_lea.vmem (!%p150_p9), [#allocation2], %s501_s10 }
  0x13   : > { %485 = vmatpush3.bf16.msra.mxu0 (!%p150_p9), %v545_v1 }
  0x15   : > { %s183_s29 = scalar_select %p182_p10, %s687_s26, 4 }
  0x16   : > { %s380_s19 = ssub.s32 (%p673_p5), 5, %s687_s26 }
  0x17   : > { %s457_s30 = sshll.u32 %s183_s29, 3  ;;  %p381_p11 = scmp.lt.s32.totalorder (%p673_p5), %s380_s19, 3 }
  0x18   : > { %s185_s6 = scalar_lea.vmem %s761_s0, %s457_s30 }
  0x19   : > { %v197_v2 = vld [vmem:[%s185_s6] sm:$0xff]  ;;  %v198_v3 = vld [vmem:[%s185_s6 + $0x8] sm:$0xff]  ;;  %v199_v4 = vld [vmem:[%s185_s6 + $0x10] sm:$0xff] }
  0x1a   : > { %v200_v5 = vpack.c.bf16 %v198_v3, %v197_v2  ;;  %v201_v6 = vpack.c.bf16 %v199_v4, %v199_v4 }
  0x1c   : > { %486 = vmatprep.mubr.msk.bf16.mxu0 %vm218_vm0, %v200_v5 }
  0x1d   : > { %487 = vmatmul.mubr.msk.bf16.vlgmr.msra.gmra.mrb[0].mxu0 %vm218_vm0, %v201_v6 }
  0xf0   : > { %v488_v9 = vpop.f32.mrb[0].mxu0 }
  0xf1   : > { %v259_v10 = vpop.f32.mrb[1].mxu0 }
  0xf2   : > { %v489_v11 = vpop.f32.mrb[2].mxu0  ;;  %493 = vmatmul.mubr.msk.f32.vlgmr.msra.gmra.mrb[0].mxu1 %vm274_vm3, %v259_v10 }
  0xf3   : > { %v262_v12 = vpop.f32.mrb[3].mxu0  ;;  %495 = vmatprep.mubr.msk.f32.mxu1 %vm611_vm2, %v610_v7 }
  0xf6   : > { %496 = vmatmul.mubr.msk.f32.gmra.mrb[2].mxu1 %vm274_vm3, %v262_v12 }
  0xf7   : > { %498 = vmatprep.mubr.msk.f32.mxu1 %vm611_vm2, %v610_v7 }
  0xfa   : > { %499 = vmatmul.mubr.msk.f32.gmra.mrb[4].mxu1 %vm274_vm3, %v488_v9 }
 0x1c5   : > { %v354_v13 = vpop.f32.mrb[0].mxu1 }
 0x1c6   : > { %368 = vst [vmem:[%s176_s11] sm:$0xff] %v354_v13  ;;  %v494_v14 = vpop.f32.mrb[1].mxu1 }
 0x1c8   : > { %378 = sbr.rel (!%p673_p5) target bundleno = 491 (0x1eb), region = 36 }
 0x1c9   : > { %v359_v15 = vpop.f32.mrb[2].mxu1 }
 0x1ca   : > { %369 = vst [vmem:[%s176_s11 + $0x8] sm:$0xff] %v359_v15  ;;  %v497_v16 = vpop.f32.mrb[3].mxu1 }
 0x1cd   : > { %v364_v17 = vpop.f32.mrb[4].mxu1 }
 0x1ce   : > { %370 = vst [vmem:[%s176_s11 + $0x10] sm:$0xff] %v364_v17  ;;  %v500_v18 = vpop.f32.mrb[5].mxu1 }
 0x1cf   : > { %s772_s19 = smov (!%p381_p11, %s380_s19), 3 }
 0x1d0   : > { %s706_s20 = sshll.u32 %s772_s19, 7 }
 0x1d1   : > { %s385_s24 = ssub.s32 384, %s706_s20 }
 0x1d2   : > { %386 = vsyncadd %s701_s17, %s385_s24  ;;  %p467_p12 = scmp.ne.s32.totalorder %s706_s20, 0  ;;  %s473_s25 = smul.u32 384, %s656_s16 }
 0x1d3   : > { %s391_s27 = sshll.u32 %s176_s11, 4  ;;  %s612_s30 = smov [#allocation2]   ;;  %s717_s27 = int_to_ptr.vmem [resolvable:$true] %s391_s27 }
 0x1d4   : > { %s715_s29 = scalar_lea.hbm %s764_s3, %s473_s25  ;;  %s546_s26 = scalar_lea.vmem %s717_s27, %s706_s20 }
 0x1d5   : > { %p547_p13 = scmp.ne.s32.totalorder %s717_s27, %s546_s26  ;;  %s550_s4 = sshll.u32 %s612_s30, 4  ;;  %s551_s4 = int_to_ptr.vmem [resolvable:$false] %s550_s4 }
 0x1d6   : > { %s552_s16 = scalar_lea.vmem %s551_s4, 768  ;;  %p553_p2 = scmp.lt.s32.totalorder %s717_s27, %s551_s4 }
 0x1d7   : > { %p548_p0 = pnand %p547_p13, %p467_p12  ;;  %p554_p3 = scmp.lt.s32.totalorder %s552_s16, %s546_s26 }
 0x1d9   : > { %p549_p1 = pneg %p548_p0  ;;  %p555_p4 = por %p554_p3, %p553_p2 }
 0x1db   : > { %p556_p5 = pnand %p555_p4, %p549_p1 }
 0x1dd   : > { %559 = shalt.err (!%p556_p5)
}
 0x1de   : > { %s560_s5 = scalar_lea.hbm %s715_s29, %s706_s20  ;;  %s564_s8 = scalar_lea.hbm %s764_s3, 640 }
 0x1df   : > { %p561_p7 = scmp.ne.s32.totalorder %s715_s29, %s560_s5  ;;  %p565_p10 = scmp.lt.u32.totalorder %s715_s29, %s764_s3 }
 0x1e0   : > { %p566_p11 = scmp.lt.u32.totalorder %s564_s8, %s560_s5  ;;  %p568_p0 = scmp.lt.u32.totalorder %s560_s5, %s715_s29 }
 0x1e1   : > { %p562_p8 = pnand %p561_p7, %p467_p12 }
 0x1e2   : > { %p567_p13 = por %p566_p11, %p565_p10 }
 0x1e3   : > { %p563_p9 = pneg %p562_p8 }
 0x1e4   : > { %p569_p1 = por %p568_p0, %p567_p13 }
 0x1e6   : > { %p570_p2 = pnand %p569_p1, %p563_p9 }
 0x1e8   : > { %573 = shalt.err (!%p570_p2)
}
 0x1e9   : > { %s613_s11 = smov 128   ;;  %s614_s19 = smov 8  }
 0x1ea   : > { %397 = dma.vmem_to_hbm [thread:$0]  (%p467_p12), %s717_s27, %s706_s20, %s715_s29, %s701_s17, %s613_s11, %s613_s11, %s614_s19  }
 0x1eb PF: > { %p507_p3 = scmp.ge.s32.totalorder %s608_s15, 2  ;;  %s406_s24 = sand.u32 1, %s596_s12  }
 0x1ec   : > { %s407_s25 = scalar_lea.sflag [#allocation3], %s406_s24 }
 0x1ed   : > { %p504_p4 = pnand %p507_p3, %p677_p6 }
 0x1ef   : > { %591 = dma.done.wait (!%p504_p4), %s407_s25, 384  }
 0x1f0   : > { %593 = vsyncadd (!%p504_p4), %s407_s25, 4294966912  ;;  %p13_p5 = scmp.ge.s32.totalorder %s660_s18, 4   ;;  %s767_s12 = smov %s600_s13 }
 0x1f1   : > { %s768_s13 = smov %s604_s14  ;;  %s769_s14 = smov %s671_s21 }
 0x1f2   : > { %s770_s15 = smov %s660_s18  ;;  %15 = sbr.rel (!%p13_p5) target bundleno = 3 (0x3), region = 67 }
 0x1f9   :  { %412 = vsyncpa [#allocation3], 1 }
 0x1fa   :  { %414 = vsyncpa [#allocation3 + $0x1], 1 }

</bundles_post_ra>
